<compile_context>
chip_gen: v6e
topology: v6e:2x2x1
jax: 0.10.0
libtpu: 0.0.40
codegen_flags: <defaults>
</compile_context>

<pallas_src>
import jax
import jax.numpy as jnp
from jax import lax
from jax.experimental import pallas as pl
from jax.experimental.pallas import tpu as pltpu

EPS = 1e-5


def _round_up(x, m):
    return (x + m - 1) // m * m


def _make_kernel(n_valid, n_pad, h_pad, c_pad):
    """Fused 5-layer MLP with training-mode BatchNorm; static sizes baked in."""
    inv_n = 1.0 / float(n_valid)
    need_mask = n_valid != n_pad

    def kernel(x_ref, w1_ref, w2_ref, w3_ref, w4_ref, w5_ref, vec_ref, o_ref):
        # Padded-row mask, hoisted once out of the per-layer BN code.  It is
        # only needed for layers >= 1: at layer 0 the zero-padded input rows
        # give exactly-zero h rows (no linear bias is added, see below), so
        # they cannot perturb the batch statistics.
        if need_mask:
            rid = lax.broadcasted_iota(jnp.int32, (n_pad, 1), 0)
            mask = (rid < n_valid).astype(jnp.float32)
        else:
            mask = None

        def bn_relu(h, layer):
            # vec_ref rows: [g1, be1, g2, be2, g3, be3, g4, be4, b5, 0...]
            # Static Ref slices -> cheap views, no full 16-row load.
            g = vec_ref[2 * layer:2 * layer + 1, :h_pad]        # [1, H]
            be = vec_ref[2 * layer + 1:2 * layer + 2, :h_pad]   # [1, H]
            # One-pass statistics: E[h], E[h^2]; var = E[h^2] - E[h]^2.
            if mask is not None and layer > 0:
                hm = h * mask
                mean = jnp.sum(hm, axis=0, keepdims=True) * inv_n
                msq = jnp.sum(hm * h, axis=0, keepdims=True) * inv_n
            else:
                mean = jnp.sum(h, axis=0, keepdims=True) * inv_n
                msq = jnp.sum(h * h, axis=0, keepdims=True) * inv_n
            var = jnp.maximum(msq - mean * mean, 0.0)   # guard cancellation
            scale = g * lax.rsqrt(var + EPS)            # rsqrt rides EUP slot
            shift = be - mean * scale
            return jnp.maximum(h * scale + shift, 0.0)

        # Note: Linear biases b1..b4 are NOT added -- training-mode BatchNorm
        # subtracts the batch mean immediately after each Linear, so the bias
        # cancels exactly (mean/variance are invariant to it).
        a = x_ref[...]                                  # bf16 [N_pad, D_pad]
        for layer, w_ref in enumerate((w1_ref, w2_ref, w3_ref, w4_ref)):
            h = jnp.dot(a, w_ref[...], preferred_element_type=jnp.float32)
            a = bn_relu(h, layer).astype(jnp.bfloat16)

        out = jnp.dot(a, w5_ref[...], preferred_element_type=jnp.float32)
        out = out + vec_ref[8:9, :c_pad]                # only b5 survives
        o_ref[...] = out.astype(o_ref.dtype)

    return kernel


def prepare_params(params):
    """Pads + casts the weights once (outside any per-step hot path) and packs
    the per-layer gamma/beta (+ final bias b5) into a single [16, F] table."""
    d_in, hidden = params["w1"].shape
    classes = params["w5"].shape[1]
    d_pad = _round_up(d_in, 128)
    h_pad = _round_up(hidden, 128)
    c_pad = _round_up(classes, 128)
    f_pack = max(h_pad, c_pad)

    def pad2(a, r, c):
        return jnp.pad(a, ((0, r - a.shape[0]), (0, c - a.shape[1])))

    prep = {
        # bf16 MXU operands (f32 accumulation happens in-kernel).
        "w1": pad2(params["w1"], d_pad, h_pad).astype(jnp.bfloat16),
        "w2": pad2(params["w2"], h_pad, h_pad).astype(jnp.bfloat16),
        "w3": pad2(params["w3"], h_pad, h_pad).astype(jnp.bfloat16),
        "w4": pad2(params["w4"], h_pad, h_pad).astype(jnp.bfloat16),
        "w5": pad2(params["w5"], h_pad, c_pad).astype(jnp.bfloat16),
    }
    rows = []
    for i in range(1, 5):
        rows += [params[f"g{i}"], params[f"be{i}"]]     # b1..b4 cancel in BN
    rows.append(params["b5"])
    packed = [jnp.pad(v[0], (0, f_pack - v.shape[1])).astype(jnp.float32)
              for v in rows]
    packed += [jnp.zeros((f_pack,), jnp.float32)] * (16 - len(packed))
    prep["vec"] = jnp.stack(packed)                     # [16, f_pack] f32
    prep["dims"] = (d_in, hidden, classes, d_pad, h_pad, c_pad)
    return prep


def feedforward(x, prep):
    """x: [N, input_size] float32; prep: output of prepare_params()."""
    d_in, hidden, classes, d_pad, h_pad, c_pad = prep["dims"]
    n = x.shape[0]
    assert x.shape[1] == d_in
    # bf16 packs 16 rows per vreg -> pad the batch to a multiple of 16.
    n_pad = _round_up(max(n, 16), 16)
    x_p = jnp.pad(x, ((0, n_pad - n), (0, d_pad - d_in))).astype(jnp.bfloat16)

    w1, w2, w3, w4, w5, vec = (prep["w1"], prep["w2"], prep["w3"],
                               prep["w4"], prep["w5"], prep["vec"])

    # VMEM budget: padded operands + a few live f32 [N_pad, F] activations,
    # with 2x margin, floored at the 32 MiB scoped default and capped
    # generation-aware (~85% of this chip's physical VMEM: ~54 MiB on v7x,
    # ~108 MiB on v5e/v6e).
    in_bytes = (x_p.size * 2
                + (w1.size + w2.size + w3.size + w4.size + w5.size) * 2
                + vec.size * 4)
    out_bytes = n_pad * c_pad * 4
    act_bytes = 3 * n_pad * max(d_pad, h_pad, c_pad) * 4
    est = in_bytes + out_bytes + act_bytes
    try:
        cap = int(0.85 * pltpu.get_tpu_info().vmem_capacity_bytes)
    except Exception:  # conservative fallback if the query is unavailable
        cap = 64 << 20
    vmem_limit = int(min(max(2 * est, 32 << 20), cap))
    # TODO(synk): if est exceeds cap (large N*H), switch to a batch-tiled grid
    # with two-phase cross-tile BatchNorm statistics instead of this
    # fully-resident single call.

    flops = 2 * n_pad * (d_pad * h_pad + 3 * h_pad * h_pad + h_pad * c_pad)
    cost = pl.CostEstimate(flops=int(flops),
                           transcendentals=int(4 * h_pad),
                           bytes_accessed=int(in_bytes + out_bytes))

    kernel = _make_kernel(n, n_pad, h_pad, c_pad)
    vmem_spec = pl.BlockSpec(memory_space=pltpu.MemorySpace.VMEM)
    out = pl.pallas_call(
        kernel,
        out_shape=jax.ShapeDtypeStruct((n_pad, c_pad), jnp.float32),
        in_specs=[vmem_spec] * 7,
        out_specs=vmem_spec,
        compiler_params=pltpu.CompilerParams(vmem_limit_bytes=vmem_limit),
        cost_estimate=cost,
    )(x_p, w1, w2, w3, w4, w5, vec)
    return out[:n, :classes]


def init_params(key, input_size, hidden_size, num_classes):
    """Deterministic parameter init (PyTorch-Linear-style uniform bounds)."""
    dims = [
        (input_size, hidden_size),
        (hidden_size, hidden_size),
        (hidden_size, hidden_size),
        (hidden_size, hidden_size),
        (hidden_size, num_classes),
    ]
    params = {}
    for i, (fan_in, fan_out) in enumerate(dims, start=1):
        key, kw, kb = jax.random.split(key, 3)
        bound = 1.0 / (fan_in ** 0.5)
        # stored as [in, out] == PyTorch weight.T
        params[f"w{i}"] = jax.random.uniform(
            kw, (fan_in, fan_out), jnp.float32, -bound, bound)
        params[f"b{i}"] = jax.random.uniform(
            kb, (1, fan_out), jnp.float32, -bound, bound)
        if i <= 4:  # BatchNorm1d affine params (PyTorch init: gamma=1, beta=0)
            params[f"g{i}"] = jnp.ones((1, fan_out), jnp.float32)
            params[f"be{i}"] = jnp.zeros((1, fan_out), jnp.float32)
    return params


def feedforward_ref(x, params):
    """Pure-JAX reference mirroring PyTorch semantics (biases included; the
    kernel drops b1..b4, which BatchNorm cancels exactly)."""
    a = x
    for i in range(1, 5):
        h = jnp.dot(a.astype(jnp.bfloat16),
                    params[f"w{i}"].astype(jnp.bfloat16),
                    preferred_element_type=jnp.float32) + params[f"b{i}"]
        mean = jnp.mean(h, axis=0, keepdims=True)
        var = jnp.mean((h - mean) ** 2, axis=0, keepdims=True)
        h = params[f"g{i}"] * (h - mean) / jnp.sqrt(var + EPS) + params[f"be{i}"]
        a = jnp.maximum(h, 0.0)
    return jnp.dot(a.astype(jnp.bfloat16),
                   params["w5"].astype(jnp.bfloat16),
                   preferred_element_type=jnp.float32) + params["b5"]


if __name__ == "__main__":
    input_size, hidden_size, num_classes = 16, 32, 8
    batch = 8

    key = jax.random.PRNGKey(0)
    key, kx = jax.random.split(key)
    x = jax.random.normal(kx, (batch, input_size), jnp.float32)
    params = init_params(key, input_size, hidden_size, num_classes)

    prep = prepare_params(params)
    out = jax.block_until_ready(feedforward(x, prep))

    ref = feedforward_ref(x, params)
    assert out.shape == (batch, num_classes)
    assert jnp.allclose(out, ref, atol=5e-3, rtol=5e-3), "mismatch vs reference"

    print("KERNEL_OK")
</pallas_src>

<mosaic_0001>
module attributes {stable_mosaic.version = 11 : i64} {
  func.func @kernel(%arg0: memref<16x128xbf16, #tpu.memory_space<vmem>>, %arg1: memref<128x128xbf16, #tpu.memory_space<vmem>>, %arg2: memref<128x128xbf16, #tpu.memory_space<vmem>>, %arg3: memref<128x128xbf16, #tpu.memory_space<vmem>>, %arg4: memref<128x128xbf16, #tpu.memory_space<vmem>>, %arg5: memref<128x128xbf16, #tpu.memory_space<vmem>>, %arg6: memref<16x128xf32, #tpu.memory_space<vmem>>, %arg7: memref<16x128xf32, #tpu.memory_space<vmem>>) attributes {dimension_semantics = [], scalar_prefetch = 0 : i64, scratch_operands = 0 : i64, tpu.core_type = #tpu.core_type<tc>} {
    %0 = tpu.iota {dimensions = array<i32: 0>} : vector<16x1xi32>
    %c8_i32 = arith.constant 8 : i32
    %1 = vector.broadcast %c8_i32 : i32 to vector<16x1xi32>
    %2 = arith.cmpi slt, %0, %1 : vector<16x1xi32>
    %3 = arith.extui %2 : vector<16x1xi1> to vector<16x1xi32>
    %4 = arith.sitofp %3 : vector<16x1xi32> to vector<16x1xf32>
    %c0 = arith.constant 0 : index
    %c0_0 = arith.constant 0 : index
    %5 = vector.load %arg0[%c0, %c0_0] : memref<16x128xbf16, #tpu.memory_space<vmem>>, vector<16x128xbf16>
    %c0_1 = arith.constant 0 : index
    %c0_2 = arith.constant 0 : index
    %6 = vector.load %arg1[%c0_1, %c0_2] : memref<128x128xbf16, #tpu.memory_space<vmem>>, vector<128x128xbf16>
    %cst = arith.constant dense<0.000000e+00> : vector<16x128xf32>
    %7 = tpu.matmul %5, %6, %cst {dimension_numbers = #tpu.dot_dimension_numbers<[1], [0], [0], [1], [0, 0, 1, 1], [], []>} : vector<16x128xbf16>, vector<128x128xbf16>, vector<16x128xf32> -> vector<16x128xf32>
    %c0_3 = arith.constant 0 : index
    %c0_4 = arith.constant 0 : index
    %8 = vector.load %arg6[%c0_3, %c0_4] : memref<16x128xf32, #tpu.memory_space<vmem>>, vector<1x128xf32>
    %c1 = arith.constant 1 : index
    %c0_5 = arith.constant 0 : index
    %9 = vector.load %arg6[%c1, %c0_5] : memref<16x128xf32, #tpu.memory_space<vmem>>, vector<1x128xf32>
    %cst_6 = arith.constant dense<0.000000e+00> : vector<128xf32>
    %10 = vector.multi_reduction <add>, %7, %cst_6 [0] : vector<16x128xf32> to vector<128xf32>
    %11 = vector.shape_cast %10 : vector<128xf32> to vector<1x128xf32>
    %cst_7 = arith.constant 1.250000e-01 : f32
    %12 = vector.broadcast %cst_7 : f32 to vector<1x128xf32>
    %13 = arith.mulf %11, %12 : vector<1x128xf32>
    %14 = arith.mulf %7, %7 : vector<16x128xf32>
    %cst_8 = arith.constant dense<0.000000e+00> : vector<128xf32>
    %15 = vector.multi_reduction <add>, %14, %cst_8 [0] : vector<16x128xf32> to vector<128xf32>
    %16 = vector.shape_cast %15 : vector<128xf32> to vector<1x128xf32>
    %cst_9 = arith.constant 1.250000e-01 : f32
    %17 = vector.broadcast %cst_9 : f32 to vector<1x128xf32>
    %18 = arith.mulf %16, %17 : vector<1x128xf32>
    %19 = arith.mulf %13, %13 : vector<1x128xf32>
    %20 = arith.subf %18, %19 : vector<1x128xf32>
    %cst_10 = arith.constant 0.000000e+00 : f32
    %21 = vector.broadcast %cst_10 : f32 to vector<1x128xf32>
    %22 = arith.maximumf %20, %21 : vector<1x128xf32>
    %cst_11 = arith.constant 9.99999974E-6 : f32
    %23 = vector.broadcast %cst_11 : f32 to vector<1x128xf32>
    %24 = arith.addf %22, %23 : vector<1x128xf32>
    %25 = math.rsqrt %24 : vector<1x128xf32>
    %26 = arith.mulf %8, %25 : vector<1x128xf32>
    %27 = arith.mulf %13, %26 : vector<1x128xf32>
    %28 = arith.subf %9, %27 : vector<1x128xf32>
    %29 = vector.broadcast %26 : vector<1x128xf32> to vector<16x128xf32>
    %30 = arith.mulf %7, %29 : vector<16x128xf32>
    %31 = vector.broadcast %28 : vector<1x128xf32> to vector<16x128xf32>
    %32 = arith.addf %30, %31 : vector<16x128xf32>
    %cst_12 = arith.constant 0.000000e+00 : f32
    %33 = vector.broadcast %cst_12 : f32 to vector<16x128xf32>
    %34 = arith.maximumf %32, %33 : vector<16x128xf32>
    %35 = arith.truncf %34 : vector<16x128xf32> to vector<16x128xbf16>
    %c0_13 = arith.constant 0 : index
    %c0_14 = arith.constant 0 : index
    %36 = vector.load %arg2[%c0_13, %c0_14] : memref<128x128xbf16, #tpu.memory_space<vmem>>, vector<128x128xbf16>
    %cst_15 = arith.constant dense<0.000000e+00> : vector<16x128xf32>
    %37 = tpu.matmul %35, %36, %cst_15 {dimension_numbers = #tpu.dot_dimension_numbers<[1], [0], [0], [1], [0, 0, 1, 1], [], []>} : vector<16x128xbf16>, vector<128x128xbf16>, vector<16x128xf32> -> vector<16x128xf32>
    %c2 = arith.constant 2 : index
    %c0_16 = arith.constant 0 : index
    %38 = vector.load %arg6[%c2, %c0_16] : memref<16x128xf32, #tpu.memory_space<vmem>>, vector<1x128xf32>
    %c3 = arith.constant 3 : index
    %c0_17 = arith.constant 0 : index
    %39 = vector.load %arg6[%c3, %c0_17] : memref<16x128xf32, #tpu.memory_space<vmem>>, vector<1x128xf32>
    %40 = vector.broadcast %4 : vector<16x1xf32> to vector<16x128xf32>
    %41 = arith.mulf %37, %40 : vector<16x128xf32>
    %cst_18 = arith.constant dense<0.000000e+00> : vector<128xf32>
    %42 = vector.multi_reduction <add>, %41, %cst_18 [0] : vector<16x128xf32> to vector<128xf32>
    %43 = vector.shape_cast %42 : vector<128xf32> to vector<1x128xf32>
    %cst_19 = arith.constant 1.250000e-01 : f32
    %44 = vector.broadcast %cst_19 : f32 to vector<1x128xf32>
    %45 = arith.mulf %43, %44 : vector<1x128xf32>
    %46 = arith.mulf %41, %37 : vector<16x128xf32>
    %cst_20 = arith.constant dense<0.000000e+00> : vector<128xf32>
    %47 = vector.multi_reduction <add>, %46, %cst_20 [0] : vector<16x128xf32> to vector<128xf32>
    %48 = vector.shape_cast %47 : vector<128xf32> to vector<1x128xf32>
    %cst_21 = arith.constant 1.250000e-01 : f32
    %49 = vector.broadcast %cst_21 : f32 to vector<1x128xf32>
    %50 = arith.mulf %48, %49 : vector<1x128xf32>
    %51 = arith.mulf %45, %45 : vector<1x128xf32>
    %52 = arith.subf %50, %51 : vector<1x128xf32>
    %cst_22 = arith.constant 0.000000e+00 : f32
    %53 = vector.broadcast %cst_22 : f32 to vector<1x128xf32>
    %54 = arith.maximumf %52, %53 : vector<1x128xf32>
    %cst_23 = arith.constant 9.99999974E-6 : f32
    %55 = vector.broadcast %cst_23 : f32 to vector<1x128xf32>
    %56 = arith.addf %54, %55 : vector<1x128xf32>
    %57 = math.rsqrt %56 : vector<1x128xf32>
    %58 = arith.mulf %38, %57 : vector<1x128xf32>
    %59 = arith.mulf %45, %58 : vector<1x128xf32>
    %60 = arith.subf %39, %59 : vector<1x128xf32>
    %61 = vector.broadcast %58 : vector<1x128xf32> to vector<16x128xf32>
    %62 = arith.mulf %37, %61 : vector<16x128xf32>
    %63 = vector.broadcast %60 : vector<1x128xf32> to vector<16x128xf32>
    %64 = arith.addf %62, %63 : vector<16x128xf32>
    %cst_24 = arith.constant 0.000000e+00 : f32
    %65 = vector.broadcast %cst_24 : f32 to vector<16x128xf32>
    %66 = arith.maximumf %64, %65 : vector<16x128xf32>
    %67 = arith.truncf %66 : vector<16x128xf32> to vector<16x128xbf16>
    %c0_25 = arith.constant 0 : index
    %c0_26 = arith.constant 0 : index
    %68 = vector.load %arg3[%c0_25, %c0_26] : memref<128x128xbf16, #tpu.memory_space<vmem>>, vector<128x128xbf16>
    %cst_27 = arith.constant dense<0.000000e+00> : vector<16x128xf32>
    %69 = tpu.matmul %67, %68, %cst_27 {dimension_numbers = #tpu.dot_dimension_numbers<[1], [0], [0], [1], [0, 0, 1, 1], [], []>} : vector<16x128xbf16>, vector<128x128xbf16>, vector<16x128xf32> -> vector<16x128xf32>
    %c4 = arith.constant 4 : index
    %c0_28 = arith.constant 0 : index
    %70 = vector.load %arg6[%c4, %c0_28] : memref<16x128xf32, #tpu.memory_space<vmem>>, vector<1x128xf32>
    %c5 = arith.constant 5 : index
    %c0_29 = arith.constant 0 : index
    %71 = vector.load %arg6[%c5, %c0_29] : memref<16x128xf32, #tpu.memory_space<vmem>>, vector<1x128xf32>
    %72 = vector.broadcast %4 : vector<16x1xf32> to vector<16x128xf32>
    %73 = arith.mulf %69, %72 : vector<16x128xf32>
    %cst_30 = arith.constant dense<0.000000e+00> : vector<128xf32>
    %74 = vector.multi_reduction <add>, %73, %cst_30 [0] : vector<16x128xf32> to vector<128xf32>
    %75 = vector.shape_cast %74 : vector<128xf32> to vector<1x128xf32>
    %cst_31 = arith.constant 1.250000e-01 : f32
    %76 = vector.broadcast %cst_31 : f32 to vector<1x128xf32>
    %77 = arith.mulf %75, %76 : vector<1x128xf32>
    %78 = arith.mulf %73, %69 : vector<16x128xf32>
    %cst_32 = arith.constant dense<0.000000e+00> : vector<128xf32>
    %79 = vector.multi_reduction <add>, %78, %cst_32 [0] : vector<16x128xf32> to vector<128xf32>
    %80 = vector.shape_cast %79 : vector<128xf32> to vector<1x128xf32>
    %cst_33 = arith.constant 1.250000e-01 : f32
    %81 = vector.broadcast %cst_33 : f32 to vector<1x128xf32>
    %82 = arith.mulf %80, %81 : vector<1x128xf32>
    %83 = arith.mulf %77, %77 : vector<1x128xf32>
    %84 = arith.subf %82, %83 : vector<1x128xf32>
    %cst_34 = arith.constant 0.000000e+00 : f32
    %85 = vector.broadcast %cst_34 : f32 to vector<1x128xf32>
    %86 = arith.maximumf %84, %85 : vector<1x128xf32>
    %cst_35 = arith.constant 9.99999974E-6 : f32
    %87 = vector.broadcast %cst_35 : f32 to vector<1x128xf32>
    %88 = arith.addf %86, %87 : vector<1x128xf32>
    %89 = math.rsqrt %88 : vector<1x128xf32>
    %90 = arith.mulf %70, %89 : vector<1x128xf32>
    %91 = arith.mulf %77, %90 : vector<1x128xf32>
    %92 = arith.subf %71, %91 : vector<1x128xf32>
    %93 = vector.broadcast %90 : vector<1x128xf32> to vector<16x128xf32>
    %94 = arith.mulf %69, %93 : vector<16x128xf32>
    %95 = vector.broadcast %92 : vector<1x128xf32> to vector<16x128xf32>
    %96 = arith.addf %94, %95 : vector<16x128xf32>
    %cst_36 = arith.constant 0.000000e+00 : f32
    %97 = vector.broadcast %cst_36 : f32 to vector<16x128xf32>
    %98 = arith.maximumf %96, %97 : vector<16x128xf32>
    %99 = arith.truncf %98 : vector<16x128xf32> to vector<16x128xbf16>
    %c0_37 = arith.constant 0 : index
    %c0_38 = arith.constant 0 : index
    %100 = vector.load %arg4[%c0_37, %c0_38] : memref<128x128xbf16, #tpu.memory_space<vmem>>, vector<128x128xbf16>
    %cst_39 = arith.constant dense<0.000000e+00> : vector<16x128xf32>
    %101 = tpu.matmul %99, %100, %cst_39 {dimension_numbers = #tpu.dot_dimension_numbers<[1], [0], [0], [1], [0, 0, 1, 1], [], []>} : vector<16x128xbf16>, vector<128x128xbf16>, vector<16x128xf32> -> vector<16x128xf32>
    %c6 = arith.constant 6 : index
    %c0_40 = arith.constant 0 : index
    %102 = vector.load %arg6[%c6, %c0_40] : memref<16x128xf32, #tpu.memory_space<vmem>>, vector<1x128xf32>
    %c7 = arith.constant 7 : index
    %c0_41 = arith.constant 0 : index
    %103 = vector.load %arg6[%c7, %c0_41] : memref<16x128xf32, #tpu.memory_space<vmem>>, vector<1x128xf32>
    %104 = vector.broadcast %4 : vector<16x1xf32> to vector<16x128xf32>
    %105 = arith.mulf %101, %104 : vector<16x128xf32>
    %cst_42 = arith.constant dense<0.000000e+00> : vector<128xf32>
    %106 = vector.multi_reduction <add>, %105, %cst_42 [0] : vector<16x128xf32> to vector<128xf32>
    %107 = vector.shape_cast %106 : vector<128xf32> to vector<1x128xf32>
    %cst_43 = arith.constant 1.250000e-01 : f32
    %108 = vector.broadcast %cst_43 : f32 to vector<1x128xf32>
    %109 = arith.mulf %107, %108 : vector<1x128xf32>
    %110 = arith.mulf %105, %101 : vector<16x128xf32>
    %cst_44 = arith.constant dense<0.000000e+00> : vector<128xf32>
    %111 = vector.multi_reduction <add>, %110, %cst_44 [0] : vector<16x128xf32> to vector<128xf32>
    %112 = vector.shape_cast %111 : vector<128xf32> to vector<1x128xf32>
    %cst_45 = arith.constant 1.250000e-01 : f32
    %113 = vector.broadcast %cst_45 : f32 to vector<1x128xf32>
    %114 = arith.mulf %112, %113 : vector<1x128xf32>
    %115 = arith.mulf %109, %109 : vector<1x128xf32>
    %116 = arith.subf %114, %115 : vector<1x128xf32>
    %cst_46 = arith.constant 0.000000e+00 : f32
    %117 = vector.broadcast %cst_46 : f32 to vector<1x128xf32>
    %118 = arith.maximumf %116, %117 : vector<1x128xf32>
    %cst_47 = arith.constant 9.99999974E-6 : f32
    %119 = vector.broadcast %cst_47 : f32 to vector<1x128xf32>
    %120 = arith.addf %118, %119 : vector<1x128xf32>
    %121 = math.rsqrt %120 : vector<1x128xf32>
    %122 = arith.mulf %102, %121 : vector<1x128xf32>
    %123 = arith.mulf %109, %122 : vector<1x128xf32>
    %124 = arith.subf %103, %123 : vector<1x128xf32>
    %125 = vector.broadcast %122 : vector<1x128xf32> to vector<16x128xf32>
    %126 = arith.mulf %101, %125 : vector<16x128xf32>
    %127 = vector.broadcast %124 : vector<1x128xf32> to vector<16x128xf32>
    %128 = arith.addf %126, %127 : vector<16x128xf32>
    %cst_48 = arith.constant 0.000000e+00 : f32
    %129 = vector.broadcast %cst_48 : f32 to vector<16x128xf32>
    %130 = arith.maximumf %128, %129 : vector<16x128xf32>
    %131 = arith.truncf %130 : vector<16x128xf32> to vector<16x128xbf16>
    %c0_49 = arith.constant 0 : index
    %c0_50 = arith.constant 0 : index
    %132 = vector.load %arg5[%c0_49, %c0_50] : memref<128x128xbf16, #tpu.memory_space<vmem>>, vector<128x128xbf16>
    %cst_51 = arith.constant dense<0.000000e+00> : vector<16x128xf32>
    %133 = tpu.matmul %131, %132, %cst_51 {dimension_numbers = #tpu.dot_dimension_numbers<[1], [0], [0], [1], [0, 0, 1, 1], [], []>} : vector<16x128xbf16>, vector<128x128xbf16>, vector<16x128xf32> -> vector<16x128xf32>
    %c8 = arith.constant 8 : index
    %c0_52 = arith.constant 0 : index
    %134 = vector.load %arg6[%c8, %c0_52] : memref<16x128xf32, #tpu.memory_space<vmem>>, vector<1x128xf32>
    %135 = vector.broadcast %134 : vector<1x128xf32> to vector<16x128xf32>
    %136 = arith.addf %133, %135 : vector<16x128xf32>
    %c0_53 = arith.constant 0 : index
    %c0_54 = arith.constant 0 : index
    %137 = vector.load %arg7[%c0_53, %c0_54] : memref<16x128xf32, #tpu.memory_space<vmem>>, vector<16x128xf32>
    tpu.vector_store %arg7[%c0_53, %c0_54], %136 {strides = array<i32>} : memref<16x128xf32, #tpu.memory_space<vmem>>, vector<16x128xf32>,
    return
  }
}

</mosaic_0001>

<bundles_post_ra>
// kernel: tpu_custom_call.1
= control target key start
LH: loop header
LB: loop body
LE: loop exit
PB: predicated region body
PF: predicated region fallthrough
CT: control target
= control target key end

     0   :  { %12 = vsyncpa [#allocation3], 0  ;;  %s1452_s0 = inlined_call_operand.hbm [shape: bf16[16,128], index: 0, kind: input, shape index: {}]   ;;  %s1453_s1 = inlined_call_operand.hbm [shape: bf16[128,128], index: 1, kind: input, shape index: {}]   ;;  %s1454_s2 = inlined_call_operand.hbm [shape: bf16[128,128], index: 2, kind: input, shape index: {}]   ;;  %s1455_s3 = inlined_call_operand.hbm [shape: bf16[128,128], index: 3, kind: input, shape index: {}]   ;;  %s1456_s4 = inlined_call_operand.hbm [shape: bf16[128,128], index: 4, kind: input, shape index: {}]   ;;  %s1457_s5 = inlined_call_operand.hbm [shape: bf16[128,128], index: 5, kind: input, shape index: {}]   ;;  %s1458_s6 = inlined_call_operand.hbm [shape: f32[16,128], index: 6, kind: input, shape index: {}]   ;;  %s1459_s7 = inlined_call_operand.hbm [shape: f32[16,128], index: 7, kind: output, shape index: {}]  }
   0x1   :  { %13 = vsyncpa [#allocation6], 0 }
   0x2   :  { %14 = vsyncpa [#allocation9], 0 }
   0x3   :  { %15 = vsyncpa [#allocation12], 0 }
   0x4   :  { %16 = vsyncpa [#allocation4], 0  ;;  %s1290_s24 = smov [#allocation5]   ;;  %s1291_s26 = smov [#allocation8]  }
   0x5   :  { %s34_s25 = sshll.u32 %s1290_s24, 4  ;;  %s58_s27 = sshll.u32 %s1291_s26, 4  ;;  %s35_s25 = int_to_ptr.vmem [resolvable:$true] %s34_s25  ;;  %s59_s27 = int_to_ptr.vmem [resolvable:$true] %s58_s27 }
   0x6   :  { %s1128_s28 = scalar_lea.vmem %s35_s25, 1024  ;;  %p1133_p1 = scmp.lt.s32.totalorder %s35_s25, %s35_s25 }
   0x7   :  { %p1129_p0 = scmp.ne.s32.totalorder %s35_s25, %s1128_s28  ;;  %p1134_p2 = scmp.lt.s32.totalorder %s1128_s28, %s1128_s28 }
   0x9   :  { %p1135_p3 = por %p1134_p2, %p1133_p1 }
   0xb   :  { %p1136_p4 = pnand %p1135_p3, %p1129_p0 }
   0xd   :  { %1139 = shalt.err (!%p1136_p4)
}
   0xe   :  { %s1292_s29 = smov 64   ;;  %s1293_s30 = smov 4  }
   0xf   :  { %40 = dma.hbm_to_vmem [thread:$0]  %s1453_s1, 1024, %s35_s25, [#allocation6], %s1292_s29, %s1292_s29, %s1293_s30  }
  0x10   :  { %s1148_s10 = scalar_lea.vmem %s59_s27, 1024  ;;  %p1153_p6 = scmp.lt.s32.totalorder %s59_s27, %s59_s27 }
  0x11   :  { %p1149_p5 = scmp.ne.s32.totalorder %s59_s27, %s1148_s10  ;;  %p1154_p7 = scmp.lt.s32.totalorder %s1148_s10, %s1148_s10 }
  0x13   :  { %p1155_p8 = por %p1154_p7, %p1153_p6 }
  0x15   :  { %p1156_p9 = pnand %p1155_p8, %p1149_p5 }
  0x17   :  { %1159 = shalt.err (!%p1156_p9)
}
  0x18   :  { %64 = dma.hbm_to_vmem [thread:$0]  %s1455_s3, 1024, %s59_s27, [#allocation9], %s1292_s29, %s1292_s29, %s1293_s30  }
  0x19   :  { %s1294_s13 = smov [#allocation11]   ;;  %s1295_s15 = smov [#allocation2]  }
  0x1a   :  { %s82_s14 = sshll.u32 %s1294_s13, 4  ;;  %s22_s16 = sshll.u32 %s1295_s15, 4  ;;  %s83_s14 = int_to_ptr.vmem [resolvable:$true] %s82_s14  ;;  %s23_s16 = int_to_ptr.vmem [resolvable:$true] %s22_s16 }
  0x1b   :  { %s1168_s1 = scalar_lea.vmem %s83_s14, 1024  ;;  %p1173_p11 = scmp.lt.s32.totalorder %s83_s14, %s83_s14 }
  0x1c   :  { %p1169_p10 = scmp.ne.s32.totalorder %s83_s14, %s1168_s1  ;;  %p1174_p12 = scmp.lt.s32.totalorder %s1168_s1, %s1168_s1 }
  0x1e   :  { %p1175_p13 = por %p1174_p12, %p1173_p11 }
  0x20   :  { %p1176_p0 = pnand %p1175_p13, %p1169_p10 }
  0x22   :  { %1179 = shalt.err (!%p1176_p0)
}
  0x23   :  { %88 = dma.hbm_to_vmem [thread:$0]  %s1457_s5, 1024, %s83_s14, [#allocation12], %s1292_s29, %s1292_s29, %s1293_s30  }
  0x24   :  { %s1188_s3 = scalar_lea.vmem %s23_s16, 128  ;;  %p1193_p2 = scmp.lt.s32.totalorder %s23_s16, %s23_s16 }
  0x25   :  { %p1189_p1 = scmp.ne.s32.totalorder %s23_s16, %s1188_s3  ;;  %p1194_p3 = scmp.lt.s32.totalorder %s1188_s3, %s1188_s3 }
  0x27   :  { %p1195_p4 = por %p1194_p3, %p1193_p2 }
  0x29   :  { %p1196_p5 = pnand %p1195_p4, %p1189_p1 }
  0x2b   :  { %1199 = shalt.err (!%p1196_p5)
}
  0x2c   :  { %28 = dma.hbm_to_vmem [thread:$0]  %s1452_s0, 128, %s23_s16, [#allocation3], %s1292_s29, %s1292_s29, %s1293_s30  }
  0x2d   :  { %s1296_s21 = smov [#allocation7]   ;;  %s1297_s23 = smov [#allocation10]  }
  0x2e   :  { %s46_s22 = sshll.u32 %s1296_s21, 4  ;;  %s70_s24 = sshll.u32 %s1297_s23, 4  ;;  %s47_s22 = int_to_ptr.vmem [resolvable:$true] %s46_s22  ;;  %s71_s24 = int_to_ptr.vmem [resolvable:$true] %s70_s24 }
  0x2f   :  { %s1208_s5 = scalar_lea.vmem %s47_s22, 1024  ;;  %p1213_p7 = scmp.lt.s32.totalorder %s47_s22, %s47_s22 }
  0x30   :  { %p1209_p6 = scmp.ne.s32.totalorder %s47_s22, %s1208_s5  ;;  %p1214_p8 = scmp.lt.s32.totalorder %s1208_s5, %s1208_s5 }
  0x32   :  { %p1215_p9 = por %p1214_p8, %p1213_p7 }
  0x34   :  { %p1216_p10 = pnand %p1215_p9, %p1209_p6 }
  0x36   :  { %1219 = shalt.err (!%p1216_p10)
}
  0x37   :  { %52 = dma.hbm_to_vmem [thread:$0]  %s1454_s2, 1024, %s47_s22, [#allocation6], %s1292_s29, %s1292_s29, %s1293_s30  }
  0x38   :  { %s1228_s0 = scalar_lea.vmem %s71_s24, 1024  ;;  %p1233_p12 = scmp.lt.s32.totalorder %s71_s24, %s71_s24 }
  0x39   :  { %p1229_p11 = scmp.ne.s32.totalorder %s71_s24, %s1228_s0  ;;  %p1234_p13 = scmp.lt.s32.totalorder %s1228_s0, %s1228_s0 }
  0x3b   :  { %p1235_p0 = por %p1234_p13, %p1233_p12 }
  0x3d   :  { %p1236_p1 = pnand %p1235_p0, %p1229_p11 }
  0x3f   :  { %1239 = shalt.err (!%p1236_p1)
}
  0x40   :  { %76 = dma.hbm_to_vmem [thread:$0]  %s1456_s4, 1024, %s71_s24, [#allocation9], %s1292_s29, %s1292_s29, %s1293_s30  }
  0x41   :  { %s1298_s8 = smov [#allocation13]  }
  0x42   :  { %s94_s9 = sshll.u32 %s1298_s8, 4  ;;  %s95_s9 = int_to_ptr.vmem [resolvable:$true] %s94_s9 }
  0x43   :  { %s1248_s10 = scalar_lea.vmem %s95_s9, 256  ;;  %p1253_p3 = scmp.lt.s32.totalorder %s95_s9, %s95_s9 }
  0x44   :  { %p1249_p2 = scmp.ne.s32.totalorder %s95_s9, %s1248_s10  ;;  %p1254_p4 = scmp.lt.s32.totalorder %s1248_s10, %s1248_s10 }
  0x46   :  { %p1255_p5 = por %p1254_p4, %p1253_p3 }
  0x48   :  { %p1256_p6 = pnand %p1255_p5, %p1249_p2 }
  0x4a   :  { %1259 = shalt.err (!%p1256_p6)
}
  0x4b   :  { %s1299_s2 = smov 128   ;;  %s1300_s11 = smov 8  }
  0x4c   :  { %100 = dma.hbm_to_vmem [thread:$0]  %s1458_s6, 256, %s95_s9, [#allocation12], %s1299_s2, %s1299_s2, %s1300_s11  }
  0x4d   :  { %1280 = dma.done.wait [#allocation3], 128  }
  0x4e   :  { %1281 = vsyncadd [#allocation3], 4294967168 }
  0x4f   :  { %1282 = dma.done.wait [#allocation6], 2048  }
  0x50   :  { %1283 = vsyncadd [#allocation6], 4294965248 }
  0x51   :  { %1284 = dma.done.wait [#allocation9], 2048  }
  0x52   :  { %1285 = vsyncadd [#allocation9], 4294965248 }
  0x53   :  { %1286 = dma.done.wait [#allocation12], 1280  }
  0x54   :  { %1287 = vsyncadd [#allocation12], 4294966016  ;;  %v1301_v0 = vmov 0.0   ;;  %vm1302_vm0 = vmmov 0   ;;  %v1071_v1 = vld [vmem:[#allocation5 + $0x38] sm:$0xff]   ;;  %v1072_v2 = vld [vmem:[#allocation5 + $0x30] sm:$0xff]   ;;  %v273_v44 = vlaneseq }
  0x55   :  { %957 = vmatprep.subr.bf16.mxu0 %v1301_v0  ;;  %973 = vmatprep.mubr.msk.bf16.mxu0 %vm1302_vm0, %v1301_v0  ;;  %v1073_v3 = vld [vmem:[#allocation5 + $0x28] sm:$0xff]   ;;  %v1074_v4 = vld [vmem:[#allocation5 + $0x20] sm:$0xff]   ;;  %v1075_v5 = vld [vmem:[#allocation5 + $0x18] sm:$0xff]   ;;  %s1303_s4 = smov [#allocation14]  }
  0x56   :  { %977 = vmatprep.subr.bf16.mxu1 %v1301_v0  ;;  %993 = vmatprep.mubr.msk.bf16.mxu1 %vm1302_vm0, %v1301_v0  ;;  %v1076_v6 = vld [vmem:[#allocation5 + $0x10] sm:$0xff]   ;;  %v1077_v7 = vld [vmem:[#allocation5 + $0x8] sm:$0xff]   ;;  %v1078_v8 = vld [vmem:[#allocation5] sm:$0xff]   ;;  %v274_v45 = vshrl.u32 %v273_v44, 7  ;;  %s855_s6 = sshll.u32 %s1303_s4, 4  ;;  %s856_s6 = int_to_ptr.vmem [resolvable:$true] %s855_s6 }
  0x57   :  { %958 = vmatpush3.bf16.msra.mxu0 %v1071_v1  ;;  %v1079_v9 = vld [vmem:[#allocation2] sm:$0xff]   ;;  %v1081_v11 = vld [vmem:[#allocation7 + $0x30] sm:$0xff]   ;;  %v1082_v12 = vld [vmem:[#allocation7 + $0x28] sm:$0xff]   ;;  %s1260_s29 = scalar_lea.vmem %s856_s6, 256  ;;  %p1265_p8 = scmp.lt.s32.totalorder %s856_s6, %s856_s6 }
  0x58   :  { %959 = vmatprep.subr.bf16.mxu0 %v1301_v0  ;;  %v1080_v10 = vld [vmem:[#allocation7 + $0x38] sm:$0xff]   ;;  %v1083_v13 = vld [vmem:[#allocation7 + $0x20] sm:$0xff]   ;;  %v1085_v15 = vld [vmem:[#allocation7 + $0x10] sm:$0xff]   ;;  %v1410_v47 = vsub.s32 0, %v274_v45  ;;  %p1261_p7 = scmp.ne.s32.totalorder %s856_s6, %s1260_s29  ;;  %p1266_p9 = scmp.lt.s32.totalorder %s1260_s29, %s1260_s29 }
  0x59   :  { %978 = vmatpush3.bf16.msra.mxu1 %v1080_v10  ;;  %v1084_v14 = vld [vmem:[#allocation7 + $0x18] sm:$0xff]   ;;  %v1086_v16 = vld [vmem:[#allocation7 + $0x8] sm:$0xff]   ;;  %v1087_v17 = vld [vmem:[#allocation7] sm:$0xff]  }
  0x5a   :  { %979 = vmatprep.subr.bf16.mxu1 %v1301_v0  ;;  %v245_v46 = vld [vmem:[#allocation13] sm:$0x1]  ;;  %v246_v50 = vld [vmem:[#allocation13 + $0x1] sm:$0x1]  ;;  %v1088_v62 = vld [vmem:[#allocation8 + $0x38] sm:$0xff]   ;;  %p1267_p10 = por %p1266_p9, %p1265_p8 }
  0x5b   :  { %960 = vmatpush3.bf16.msra.mxu0 %v1072_v2  ;;  %v1089_v63 = vld [vmem:[#allocation8 + $0x30] sm:$0xff]   ;;  %v1090_v1 = vld [vmem:[#allocation8 + $0x28] sm:$0xff]   ;;  %v1091_v2 = vld [vmem:[#allocation8 + $0x20] sm:$0xff]  }
  0x5c   :  { %961 = vmatprep.subr.bf16.mxu0 %v1301_v0  ;;  %p1268_p11 = pnand %p1267_p10, %p1261_p7 }
  0x5d   :  { %980 = vmatpush3.bf16.msra.mxu1 %v1081_v11 }
  0x5e   :  { %981 = vmatprep.subr.bf16.mxu1 %v1301_v0 }
  0x5f   :  { %962 = vmatpush3.bf16.msra.mxu0 %v1073_v3  ;;  %v1092_v3 = vld [vmem:[#allocation8 + $0x18] sm:$0xff]  }
  0x60   :  { %963 = vmatprep.subr.bf16.mxu0 %v1301_v0 }
  0x61   :  { %982 = vmatpush3.bf16.msra.mxu1 %v1082_v12 }
  0x62   :  { %983 = vmatprep.subr.bf16.mxu1 %v1301_v0 }
  0x63   :  { %964 = vmatpush3.bf16.msra.mxu0 %v1074_v4  ;;  %v1093_v4 = vld [vmem:[#allocation8 + $0x10] sm:$0xff]  }
  0x64   :  { %965 = vmatprep.subr.bf16.mxu0 %v1301_v0 }
  0x65   :  { %984 = vmatpush3.bf16.msra.mxu1 %v1083_v13 }
  0x66   :  { %985 = vmatprep.subr.bf16.mxu1 %v1301_v0 }
  0x67   :  { %966 = vmatpush3.bf16.msra.mxu0 %v1075_v5  ;;  %v1094_v5 = vld [vmem:[#allocation8 + $0x8] sm:$0xff]  }
  0x68   :  { %967 = vmatprep.subr.bf16.mxu0 %v1301_v0 }
  0x69   :  { %986 = vmatpush3.bf16.msra.mxu1 %v1084_v14 }
  0x6a   :  { %987 = vmatprep.subr.bf16.mxu1 %v1301_v0 }
  0x6b   :  { %968 = vmatpush3.bf16.msra.mxu0 %v1076_v6  ;;  %v1095_v6 = vld [vmem:[#allocation8] sm:$0xff]  }
  0x6c   :  { %969 = vmatprep.subr.bf16.mxu0 %v1301_v0 }
  0x6d   :  { %988 = vmatpush3.bf16.msra.mxu1 %v1085_v15 }
  0x6e   :  { %989 = vmatprep.subr.bf16.mxu1 %v1301_v0 }
  0x6f   :  { %970 = vmatpush3.bf16.msra.mxu0 %v1077_v7 }
  0x70   :  { %971 = vmatprep.subr.bf16.mxu0 %v1301_v0 }
  0x71   :  { %990 = vmatpush3.bf16.msra.mxu1 %v1086_v16 }
  0x72   :  { %991 = vmatprep.subr.bf16.mxu1 %v1301_v0 }
  0x73   :  { %972 = vmatpush3.bf16.msra.mxu0 %v1078_v8 }
  0x74   :  { %997 = vmatprep.subr.bf16.mxu0 %v1301_v0 }
  0x75   :  { %992 = vmatpush3.bf16.msra.mxu1 %v1087_v17 }
  0x76   :  { %974 = vmatmul.mubr.bf16.vlgmr.msra.gmra.mxu0 %v1079_v9  ;;  %1017 = vmatprep.subr.bf16.mxu1 %v1301_v0 }
  0x77   :  { %1013 = vmatprep.mubr.msk.bf16.mxu0 %vm1302_vm0, %v1301_v0  ;;  %998 = vmatpush3.bf16.msra.mxu0 %v1088_v62 }
  0x78   :  { %999 = vmatprep.subr.bf16.mxu0 %v1301_v0 }
  0x7b   :  { %1000 = vmatpush3.bf16.msra.mxu0 %v1089_v63 }
  0x7c   :  { %1001 = vmatprep.subr.bf16.mxu0 %v1301_v0 }
  0x7f   :  { %1002 = vmatpush3.bf16.msra.mxu0 %v1090_v1 }
  0x80   :  { %1003 = vmatprep.subr.bf16.mxu0 %v1301_v0 }
  0x83   :  { %1004 = vmatpush3.bf16.msra.mxu0 %v1091_v2 }
  0x84   :  { %1005 = vmatprep.subr.bf16.mxu0 %v1301_v0 }
  0x87   :  { %1006 = vmatpush3.bf16.msra.mxu0 %v1092_v3 }
  0x88   :  { %1007 = vmatprep.subr.bf16.mxu0 %v1301_v0 }
  0x8b   :  { %1008 = vmatpush3.bf16.msra.mxu0 %v1093_v4 }
  0x8c   :  { %1009 = vmatprep.subr.bf16.mxu0 %v1301_v0 }
  0x8f   :  { %1010 = vmatpush3.bf16.msra.mxu0 %v1094_v5 }
  0x90   :  { %1011 = vmatprep.subr.bf16.mxu0 %v1301_v0 }
  0x93   :  { %1012 = vmatpush3.bf16.msra.mxu0 %v1095_v6 }
  0x94   :  { %1037 = vmatprep.subr.bf16.mxu0 %v1301_v0 }
 0x136   :  { %v238_v18 = vpop.f32.mrf.mxu0 }
 0x137   :  { %v255_v21 = vmul.f32 %v238_v18, %v238_v18 }
 0x138   :  { %v975_v19 = vpop.f32.mrf.mxu0 }
 0x13a   :  { %v241_v20 = vpop.f32.mrf.mxu0 }
 0x13b   :  { %v247_v22 = vadd.f32 %v241_v20, %v238_v18  ;;  %v256_v23 = vmul.f32 %v241_v20, %v241_v20 }
 0x13c   :  { %v976_v24 = vpop.f32.mrf.mxu0 }
 0x13d   :  { %v248_v25 = vrot.slane %v247_v22, 4  ;;  %v257_v26 = vadd.f32 %v256_v23, %v255_v21 }
 0x13f   :  { %v249_v27 = vadd.f32 %v248_v25, %v247_v22  ;;  %v258_v28 = vrot.slane %v257_v26, 4 }
 0x141   :  { %v250_v29 = vrot.slane %v249_v27, 2  ;;  %v259_v30 = vadd.f32 %v258_v28, %v257_v26 }
 0x143   :  { %v251_v31 = vadd.f32 %v250_v29, %v249_v27  ;;  %v260_v32 = vrot.slane %v259_v30, 2 }
 0x145   :  { %v252_v33 = vrot.slane %v251_v31, 1  ;;  %v261_v34 = vadd.f32 %v260_v32, %v259_v30 }
 0x147   :  { %v253_v35 = vadd.f32 %v252_v33, %v251_v31  ;;  %v262_v36 = vrot.slane %v261_v34, 1 }
 0x149   :  { %v254_v37 = vmul.f32 0.125, %v253_v35  ;;  %v263_v38 = vadd.f32 %v262_v36, %v261_v34  ;;  %v393_v34 = vld [vmem:[#allocation13 + $0x2] sm:$0x1] }
 0x14b   :  { %v264_v39 = vmul.f32 0.125, %v263_v38  ;;  %v265_v40 = vmul.f32 %v254_v37, %v254_v37 }
 0x14d   :  { %v266_v41 = vsub.f32 %v264_v39, %v265_v40 }
 0x14f   :  { %v267_v42 = vmax.f32 %v266_v41, 0.0 }
 0x151   :  { %v268_v43 = vadd.f32 1e-05, %v267_v42 }
 0x153   :  { %1112 = vrsqrt.f32 %v268_v43 }
 0x160   :  { %v1113_v48 = vpop.eup %1112 }
 0x161   :  { %v270_v49 = vmul.f32 %v1113_v48, %v245_v46 }
 0x163   :  { %v271_v51 = vmul.f32 %v270_v49, %v254_v37  ;;  %v276_v52 = vrot.slane %v270_v49, %v1410_v47  ;;  %v394_v37 = vld [vmem:[#allocation13 + $0x3] sm:$0x1] }
 0x165   :  { %v272_v53 = vsub.f32 %v246_v50, %v271_v51  ;;  %v277_v54 = vmul.f32 %v276_v52, %v238_v18  ;;  %v278_v55 = vmul.f32 %v276_v52, %v241_v20  ;;  %v1096_v50 = vld [vmem:[#allocation10 + $0x38] sm:$0xff]   ;;  %v1097_v51 = vld [vmem:[#allocation10 + $0x30] sm:$0xff]   ;;  %v1098_v52 = vld [vmem:[#allocation10 + $0x28] sm:$0xff]  }
 0x167   :  { %v282_v56 = vrot.slane %v272_v53, %v1410_v47  ;;  %v1099_v53 = vld [vmem:[#allocation10 + $0x20] sm:$0xff]  }
 0x169   :  { %v284_v57 = vadd.f32 %v282_v56, %v278_v55  ;;  %v283_v58 = vadd.f32 %v282_v56, %v277_v54  ;;  %v1100_v54 = vld [vmem:[#allocation10 + $0x18] sm:$0xff]   ;;  %v1101_v55 = vld [vmem:[#allocation10 + $0x10] sm:$0xff]   ;;  %v1102_v56 = vld [vmem:[#allocation10 + $0x8] sm:$0xff]  }
 0x16b   :  { %v285_v59 = vmax.f32 %v283_v58, 0.0  ;;  %v286_v60 = vmax.f32 %v284_v57, 0.0  ;;  %v1103_v57 = vld [vmem:[#allocation10] sm:$0xff]  }
 0x16d   :  { %v287_v61 = vpack.c.bf16 %v286_v60, %v285_v59 }
 0x16f   :  { %994 = vmatmul.mubr.bf16.vlgmr.msra.gmra.mxu1 %v287_v61 }
 0x170   :  { %1033 = vmatprep.mubr.msk.bf16.mxu1 %vm1302_vm0, %v1301_v0  ;;  %1018 = vmatpush3.bf16.msra.mxu1 %v1096_v50 }
 0x171   :  { %1019 = vmatprep.subr.bf16.mxu1 %v1301_v0 }
 0x174   :  { %1020 = vmatpush3.bf16.msra.mxu1 %v1097_v51 }
 0x175   :  { %1021 = vmatprep.subr.bf16.mxu1 %v1301_v0 }
 0x178   :  { %1022 = vmatpush3.bf16.msra.mxu1 %v1098_v52 }
 0x179   :  { %1023 = vmatprep.subr.bf16.mxu1 %v1301_v0 }
 0x17c   :  { %1024 = vmatpush3.bf16.msra.mxu1 %v1099_v53 }
 0x17d   :  { %1025 = vmatprep.subr.bf16.mxu1 %v1301_v0 }
 0x180   :  { %1026 = vmatpush3.bf16.msra.mxu1 %v1100_v54 }
 0x181   :  { %1027 = vmatprep.subr.bf16.mxu1 %v1301_v0 }
 0x184   :  { %1028 = vmatpush3.bf16.msra.mxu1 %v1101_v55 }
 0x185   :  { %1029 = vmatprep.subr.bf16.mxu1 %v1301_v0 }
 0x188   :  { %1030 = vmatpush3.bf16.msra.mxu1 %v1102_v56 }
 0x189   :  { %1031 = vmatprep.subr.bf16.mxu1 %v1301_v0 }
 0x18c   :  { %1032 = vmatpush3.bf16.msra.mxu1 %v1103_v57 }
 0x22f   :  { %v386_v7 = vpop.f32.mrf.mxu1 }
 0x230   :  { %v405_v12 = vmul.f32 %v386_v7, %v386_v7 }
 0x231   :  { %v995_v8 = vpop.f32.mrf.mxu1 }
 0x233   :  { %v389_v9 = vpop.f32.mrf.mxu1 }
 0x234   :  { %v396_v10 = vmul.f32 0.0, %v389_v9 }
 0x235   :  { %v996_v11 = vpop.f32.mrf.mxu1 }
 0x236   :  { %v397_v13 = vadd.f32 %v396_v10, %v386_v7  ;;  %v406_v14 = vmul.f32 %v396_v10, %v389_v9 }
 0x238   :  { %v398_v15 = vrot.slane %v397_v13, 4  ;;  %v407_v16 = vadd.f32 %v406_v14, %v405_v12 }
 0x23a   :  { %v399_v17 = vadd.f32 %v398_v15, %v397_v13  ;;  %v408_v18 = vrot.slane %v407_v16, 4 }
 0x23c   :  { %v400_v19 = vrot.slane %v399_v17, 2  ;;  %v409_v20 = vadd.f32 %v408_v18, %v407_v16 }
 0x23e   :  { %v401_v21 = vadd.f32 %v400_v19, %v399_v17  ;;  %v410_v22 = vrot.slane %v409_v20, 2 }
 0x240   :  { %v402_v23 = vrot.slane %v401_v21, 1  ;;  %v411_v24 = vadd.f32 %v410_v22, %v409_v20  ;;  %v543_v22 = vld [vmem:[#allocation13 + $0x4] sm:$0x1] }
 0x242   :  { %v403_v25 = vadd.f32 %v402_v23, %v401_v21  ;;  %v412_v26 = vrot.slane %v411_v24, 1 }
 0x244   :  { %v404_v27 = vmul.f32 0.125, %v403_v25  ;;  %v413_v28 = vadd.f32 %v412_v26, %v411_v24  ;;  %v544_v25 = vld [vmem:[#allocation13 + $0x5] sm:$0x1] }
 0x246   :  { %v414_v29 = vmul.f32 0.125, %v413_v28  ;;  %v415_v30 = vmul.f32 %v404_v27, %v404_v27 }
 0x248   :  { %v416_v31 = vsub.f32 %v414_v29, %v415_v30 }
 0x24a   :  { %v417_v32 = vmax.f32 %v416_v31, 0.0 }
 0x24c   :  { %v418_v33 = vadd.f32 1e-05, %v417_v32 }
 0x24e   :  { %1114 = vrsqrt.f32 %v418_v33 }
 0x25b   :  { %v1115_v35 = vpop.eup %1114 }
 0x25c   :  { %v420_v36 = vmul.f32 %v1115_v35, %v393_v34 }
 0x25e   :  { %v421_v38 = vmul.f32 %v420_v36, %v404_v27  ;;  %v426_v39 = vrot.slane %v420_v36, %v1410_v47 }
 0x260   :  { %v422_v40 = vsub.f32 %v394_v37, %v421_v38  ;;  %v427_v41 = vmul.f32 %v426_v39, %v386_v7  ;;  %v428_v42 = vmul.f32 %v426_v39, %v389_v9  ;;  %v1104_v37 = vld [vmem:[#allocation11 + $0x38] sm:$0xff]   ;;  %v1105_v38 = vld [vmem:[#allocation11 + $0x30] sm:$0xff]   ;;  %v1106_v39 = vld [vmem:[#allocation11 + $0x28] sm:$0xff]  }
 0x262   :  { %v432_v43 = vrot.slane %v422_v40, %v1410_v47  ;;  %v1107_v40 = vld [vmem:[#allocation11 + $0x20] sm:$0xff]  }
 0x264   :  { %v433_v44 = vadd.f32 %v432_v43, %v427_v41  ;;  %v434_v45 = vadd.f32 %v432_v43, %v428_v42  ;;  %v1108_v41 = vld [vmem:[#allocation11 + $0x18] sm:$0xff]   ;;  %v1109_v42 = vld [vmem:[#allocation11 + $0x10] sm:$0xff]   ;;  %v1110_v43 = vld [vmem:[#allocation11 + $0x8] sm:$0xff]  }
 0x266   :  { %v436_v46 = vmax.f32 %v434_v45, 0.0  ;;  %v435_v48 = vmax.f32 %v433_v44, 0.0  ;;  %v1111_v44 = vld [vmem:[#allocation11] sm:$0xff]  }
 0x268   :  { %v437_v49 = vpack.c.bf16 %v436_v46, %v435_v48 }
 0x26a   :  { %1014 = vmatmul.mubr.bf16.vlgmr.msra.gmra.mxu0 %v437_v49 }
 0x26b   :  { %1053 = vmatprep.mubr.msk.bf16.mxu0 %vm1302_vm0, %v1301_v0  ;;  %1038 = vmatpush3.bf16.msra.mxu0 %v1104_v37 }
 0x26c   :  { %1039 = vmatprep.subr.bf16.mxu0 %v1301_v0 }
 0x26f   :  { %1040 = vmatpush3.bf16.msra.mxu0 %v1105_v38 }
 0x270   :  { %1041 = vmatprep.subr.bf16.mxu0 %v1301_v0 }
 0x273   :  { %1042 = vmatpush3.bf16.msra.mxu0 %v1106_v39 }
 0x274   :  { %1043 = vmatprep.subr.bf16.mxu0 %v1301_v0 }
 0x277   :  { %1044 = vmatpush3.bf16.msra.mxu0 %v1107_v40 }
 0x278   :  { %1045 = vmatprep.subr.bf16.mxu0 %v1301_v0 }
 0x27b   :  { %1046 = vmatpush3.bf16.msra.mxu0 %v1108_v41 }
 0x27c   :  { %1047 = vmatprep.subr.bf16.mxu0 %v1301_v0 }
 0x27f   :  { %1048 = vmatpush3.bf16.msra.mxu0 %v1109_v42 }
 0x280   :  { %1049 = vmatprep.subr.bf16.mxu0 %v1301_v0 }
 0x283   :  { %1050 = vmatpush3.bf16.msra.mxu0 %v1110_v43 }
 0x284   :  { %1051 = vmatprep.subr.bf16.mxu0 %v1301_v0 }
 0x287   :  { %1052 = vmatpush3.bf16.msra.mxu0 %v1111_v44 }
 0x32a   :  { %v536_v58 = vpop.f32.mrf.mxu0 }
 0x32b   :  { %v555_v63 = vmul.f32 %v536_v58, %v536_v58 }
 0x32c   :  { %v1015_v59 = vpop.f32.mrf.mxu0 }
 0x32e   :  { %v539_v60 = vpop.f32.mrf.mxu0 }
 0x32f   :  { %v546_v61 = vmul.f32 0.0, %v539_v60 }
 0x330   :  { %v1016_v62 = vpop.f32.mrf.mxu0 }
 0x331   :  { %v547_v1 = vadd.f32 %v546_v61, %v536_v58  ;;  %v556_v2 = vmul.f32 %v546_v61, %v539_v60 }
 0x333   :  { %v548_v3 = vrot.slane %v547_v1, 4  ;;  %v557_v4 = vadd.f32 %v556_v2, %v555_v63 }
 0x335   :  { %v549_v5 = vadd.f32 %v548_v3, %v547_v1  ;;  %v558_v6 = vrot.slane %v557_v4, 4 }
 0x337   :  { %v550_v7 = vrot.slane %v549_v5, 2  ;;  %v559_v8 = vadd.f32 %v558_v6, %v557_v4 }
 0x339   :  { %v551_v9 = vadd.f32 %v550_v7, %v549_v5  ;;  %v560_v10 = vrot.slane %v559_v8, 2 }
 0x33b   :  { %v552_v11 = vrot.slane %v551_v9, 1  ;;  %v561_v12 = vadd.f32 %v560_v10, %v559_v8 }
 0x33d   :  { %v553_v13 = vadd.f32 %v552_v11, %v551_v9  ;;  %v562_v14 = vrot.slane %v561_v12, 1  ;;  %v693_v9 = vld [vmem:[#allocation13 + $0x6] sm:$0x1] }
 0x33f   :  { %v554_v15 = vmul.f32 0.125, %v553_v13  ;;  %v563_v16 = vadd.f32 %v562_v14, %v561_v12  ;;  %v694_v12 = vld [vmem:[#allocation13 + $0x7] sm:$0x1] }
 0x341   :  { %v564_v17 = vmul.f32 0.125, %v563_v16  ;;  %v565_v18 = vmul.f32 %v554_v15, %v554_v15 }
 0x343   :  { %v566_v19 = vsub.f32 %v564_v17, %v565_v18 }
 0x345   :  { %v567_v20 = vmax.f32 %v566_v19, 0.0 }
 0x347   :  { %v568_v21 = vadd.f32 1e-05, %v567_v20 }
 0x349   :  { %1116 = vrsqrt.f32 %v568_v21 }
 0x356   :  { %v1117_v23 = vpop.eup %1116 }
 0x357   :  { %v570_v24 = vmul.f32 %v1117_v23, %v543_v22 }
 0x359   :  { %v571_v26 = vmul.f32 %v570_v24, %v554_v15  ;;  %v576_v27 = vrot.slane %v570_v24, %v1410_v47  ;;  %v903_v24 = vld [vmem:[#allocation13 + $0x8] ss:$0 sm:$0xff] }
 0x35b   :  { %v572_v28 = vsub.f32 %v544_v25, %v571_v26  ;;  %v577_v29 = vmul.f32 %v576_v27, %v536_v58  ;;  %v578_v30 = vmul.f32 %v576_v27, %v539_v60 }
 0x35d   :  { %v582_v31 = vrot.slane %v572_v28, %v1410_v47 }
 0x35f   :  { %v583_v32 = vadd.f32 %v582_v31, %v577_v29  ;;  %v584_v33 = vadd.f32 %v582_v31, %v578_v30 }
 0x361   :  { %v586_v34 = vmax.f32 %v584_v33, 0.0  ;;  %v585_v35 = vmax.f32 %v583_v32, 0.0 }
 0x363   :  { %v587_v36 = vpack.c.bf16 %v586_v34, %v585_v35 }
 0x365   :  { %1034 = vmatmul.mubr.bf16.vlgmr.msra.gmra.mxu1 %v587_v36 }
 0x425   :  { %v686_v45 = vpop.f32.mrf.mxu1 }
 0x426   :  { %v705_v51 = vmul.f32 %v686_v45, %v686_v45 }
 0x427   :  { %v1035_v46 = vpop.f32.mrf.mxu1 }
 0x429   :  { %v689_v48 = vpop.f32.mrf.mxu1 }
 0x42a   :  { %v696_v49 = vmul.f32 0.0, %v689_v48 }
 0x42b   :  { %v1036_v50 = vpop.f32.mrf.mxu1 }
 0x42c   :  { %v697_v52 = vadd.f32 %v696_v49, %v686_v45  ;;  %v706_v53 = vmul.f32 %v696_v49, %v689_v48 }
 0x42e   :  { %v698_v54 = vrot.slane %v697_v52, 4  ;;  %v707_v55 = vadd.f32 %v706_v53, %v705_v51 }
 0x430   :  { %v699_v56 = vadd.f32 %v698_v54, %v697_v52  ;;  %v708_v57 = vrot.slane %v707_v55, 4 }
 0x432   :  { %v700_v58 = vrot.slane %v699_v56, 2  ;;  %v709_v59 = vadd.f32 %v708_v57, %v707_v55 }
 0x434   :  { %v701_v60 = vadd.f32 %v700_v58, %v699_v56  ;;  %v710_v61 = vrot.slane %v709_v59, 2 }
 0x436   :  { %v702_v62 = vrot.slane %v701_v60, 1  ;;  %v711_v0 = vadd.f32 %v710_v61, %v709_v59 }
 0x438   :  { %v703_v63 = vadd.f32 %v702_v62, %v701_v60  ;;  %v712_v1 = vrot.slane %v711_v0, 1 }
 0x43a   :  { %v704_v2 = vmul.f32 0.125, %v703_v63  ;;  %v713_v3 = vadd.f32 %v712_v1, %v711_v0 }
 0x43c   :  { %v714_v4 = vmul.f32 0.125, %v713_v3  ;;  %v715_v5 = vmul.f32 %v704_v2, %v704_v2 }
 0x43e   :  { %v716_v6 = vsub.f32 %v714_v4, %v715_v5 }
 0x440   :  { %v717_v7 = vmax.f32 %v716_v6, 0.0 }
 0x442   :  { %v718_v8 = vadd.f32 1e-05, %v717_v7 }
 0x444   :  { %1118 = vrsqrt.f32 %v718_v8 }
 0x451   :  { %v1119_v10 = vpop.eup %1118 }
 0x452   :  { %v720_v11 = vmul.f32 %v1119_v10, %v693_v9 }
 0x454   :  { %v721_v13 = vmul.f32 %v720_v11, %v704_v2  ;;  %v726_v14 = vrot.slane %v720_v11, %v1410_v47 }
 0x456   :  { %v722_v15 = vsub.f32 %v694_v12, %v721_v13  ;;  %v727_v16 = vmul.f32 %v726_v14, %v686_v45  ;;  %v728_v17 = vmul.f32 %v726_v14, %v689_v48 }
 0x458   :  { %v732_v18 = vrot.slane %v722_v15, %v1410_v47 }
 0x45a   :  { %v733_v19 = vadd.f32 %v732_v18, %v727_v16  ;;  %v734_v20 = vadd.f32 %v732_v18, %v728_v17 }
 0x45c   :  { %v736_v21 = vmax.f32 %v734_v20, 0.0  ;;  %v735_v22 = vmax.f32 %v733_v19, 0.0 }
 0x45e   :  { %v737_v23 = vpack.c.bf16 %v736_v21, %v735_v22 }
 0x460   :  { %1054 = vmatmul.mubr.bf16.vlgmr.msra.gmra.mxu0 %v737_v23 }
 0x520   :  { %v841_v25 = vpop.f32.mrf.mxu0 }
 0x521   :  { %v842_v26 = vadd.f32 %v903_v24, %v841_v25 }
 0x522   :  { %v1055_v27 = vpop.f32.mrf.mxu0 }
 0x523   :  { %848 = vst [vmem:[#allocation14] sm:$0xff] %v842_v26 }
 0x524   :  { %v844_v28 = vpop.f32.mrf.mxu0 }
 0x525   :  { %v845_v29 = vadd.f32 %v903_v24, %v844_v28 }
 0x526   :  { %v1056_v30 = vpop.f32.mrf.mxu0 }
 0x527   :  { %849 = vst [vmem:[#allocation14 + $0x8] sm:$0xff] %v845_v29 }
 0x528   :  { %1271 = shalt.err (!%p1268_p11)
}
 0x529   :  { %861 = dma.vmem_to_hbm [thread:$0]  %s856_s6, 256, %s1459_s7, [#allocation4], %s1299_s2, %s1299_s2, %s1300_s11  }
 0x52a   :  { %1288 = dma.done.wait [#allocation4], 256  }
 0x52b   :  { %1289 = vsyncadd [#allocation4], 4294967040 }
 0x52c   :  { %865 = vsyncpa [#allocation3], 1 }
 0x52d   :  { %866 = vsyncpa [#allocation6], 1 }
 0x52e   :  { %867 = vsyncpa [#allocation9], 1 }
 0x52f   :  { %868 = vsyncpa [#allocation12], 1 }
 0x530   :  { %869 = vsyncpa [#allocation4], 1 }

</bundles_post_ra>
